<compile_context>
chip_gen: v7x
topology: tpu7x:2x2x1
jax: 0.10.0
libtpu: 0.0.40
codegen_flags: <defaults>
</compile_context>

<pallas_src>
import functools

import jax
import jax.numpy as jnp
from jax.experimental import pallas as pl
from jax.experimental.pallas import tpu as pltpu


def _mlp_kernel(x_ref, w1_ref, b1_ref, w2_ref, b2_ref, o_ref):
    # Layer 1: bf16 x bf16 matmul on the MXU, f32 accumulation.
    h = jnp.dot(x_ref[...], w1_ref[...], preferred_element_type=jnp.float32)
    # Epilogue in f32 (bias + ReLU) -- correct on v5e too (no bf16 VPU/EUP there).
    h = jnp.maximum(h + b1_ref[...], 0.0)                 # (TB, H) + (1, H)
    # Layer 2: cast activation back to bf16 for the MXU, accumulate in f32.
    y = jnp.dot(h.astype(w2_ref.dtype), w2_ref[...],
                preferred_element_type=jnp.float32)
    y = y + b2_ref[...]                                   # (TB, TN) + (1, TN)
    o_ref[...] = jax.nn.sigmoid(y).astype(o_ref.dtype)


def _chip_profile():
    """(num_tensorcores, vmem_byte_cap) for the local TPU generation."""
    dev = jax.devices()[0]
    kind = str(getattr(dev, "device_kind", "")).lower()
    if "v7" in kind:
        # v7x: 2 TensorCores/chip, only 64 MiB VMEM per TC -> leave headroom.
        return 2, 56 * 1024 * 1024
    # v5e / v6e: 1 TensorCore, 128 MiB VMEM.
    return 1, 100 * 1024 * 1024


def _choose_tiles(B, N, num_tc):
    # Batch tile: multiple of 16 (bf16 sublane packing), capped at 256 (MXU height).
    if B <= 16:
        tile_b = B
    else:
        tile_b = min(256, (B // 16) * 16)
    tile_n = N

    # Only on 2-TC chips (v7x): if the batch grid has a single step, split work.
    # Prefer a batch split (each TC does half of BOTH matmuls, no duplicated x@W1);
    # fall back to an N-split only when the batch is too small for two >=16-row tiles.
    if num_tc >= 2 and pl.cdiv(B, tile_b) < num_tc:
        if B >= 32:
            tile_b = max(16, (B // 32) * 16)
        elif N % 256 == 0:
            tile_n = N // 2
    return tile_b, tile_n


def _build_pallas_call(B, N, H, tile_b, tile_n, out_dtype, vmem_limit,
                       single_buffer_weights):
    grid = (pl.cdiv(B, tile_b), pl.cdiv(N, tile_n))
    n_split = grid[1] > 1

    def wspec(shape, index_map, resident):
        # Constant-index (resident) weights only need one VMEM buffer; this only
        # matters once W1 is a meaningful fraction of VMEM (gated by the caller).
        if single_buffer_weights and resident:
            return pl.BlockSpec(shape, index_map, pipeline_mode=pl.Buffered(1))
        return pl.BlockSpec(shape, index_map)

    in_specs = [
        pl.BlockSpec((tile_b, N), lambda i, j: (i, 0)),                # x tile (bf16)
        wspec((N, H), lambda i, j: (0, 0), True),                      # W1 (bf16, resident)
        wspec((1, H), lambda i, j: (0, 0), True),                      # b1 (f32, resident)
        wspec((H, tile_n), lambda i, j: (0, j), not n_split),          # W2 (bf16)
        wspec((1, tile_n), lambda i, j: (0, j), not n_split),          # b2 (f32)
    ]
    out_specs = pl.BlockSpec((tile_b, tile_n), lambda i, j: (i, j))    # lane-dense output

    out_itemsize = jnp.dtype(out_dtype).itemsize
    # Layer-1 FLOPs are duplicated once per N tile (only happens on the v7x fallback).
    cost = pl.CostEstimate(
        flops=2 * B * N * H * grid[1] + 2 * B * H * N,
        transcendentals=B * N,
        bytes_accessed=(B * N * 2 + N * H * 2 + H * N * 2 + (H + N) * 4
                        + B * N * out_itemsize),
    )

    return pl.pallas_call(
        _mlp_kernel,
        out_shape=jax.ShapeDtypeStruct((B, N), out_dtype),
        grid_spec=pltpu.PrefetchScalarGridSpec(
            num_scalar_prefetch=0,
            grid=grid,
            in_specs=in_specs,
            out_specs=out_specs,
        ),
        compiler_params=pltpu.CompilerParams(
            dimension_semantics=("parallel", "parallel"),
            vmem_limit_bytes=vmem_limit,
        ),
        cost_estimate=cost,
    )


def prepare_params(w1, b1, w2, b2):
    """One-time (init-time) conversion to kernel storage formats.

    Weights are stored transposed vs PyTorch: W1:(num_params, 512), W2:(512, num_params).
    Returns bf16 weights and f32 row-vector biases so the jitted forward does no
    per-call weight casting/reshaping.
    """
    N, H = w1.shape
    assert w2.shape == (H, N) and b1.shape == (H,) and b2.shape == (N,)
    return (w1.astype(jnp.bfloat16),
            b1.astype(jnp.float32).reshape(1, H),
            w2.astype(jnp.bfloat16),
            b2.astype(jnp.float32).reshape(1, N))


@functools.partial(jax.jit, static_argnames=("out_dtype",))
def plasticity_controller_forward(x, w1_bf, b1_2d, w2_bf, b2_2d,
                                  out_dtype=jnp.float32):
    """x: (B, num_params) f32 grad norms -> (B, num_params) sigmoid gates.

    Params must come from prepare_params() (bf16 weights, f32 (1,H)/(1,N) biases).
    """
    B, N = x.shape
    H = w1_bf.shape[1]
    assert w1_bf.shape == (N, H) and w2_bf.shape == (H, N)
    assert b1_2d.shape == (1, H) and b2_2d.shape == (1, N)

    num_tc, vmem_cap = _chip_profile()
    tile_b, tile_n = _choose_tiles(B, N, num_tc)

    # Only single-buffer the resident W1/b1 when W1 is big enough to matter (>8 MiB).
    single_buffer_weights = (N * H * 2) > (8 << 20)
    wbuf = 1 if single_buffer_weights else 2

    out_itemsize = jnp.dtype(out_dtype).itemsize
    vmem_needed = (
        2 * tile_b * N * 2                        # x tiles (bf16, double-buffered)
        + 2 * tile_b * tile_n * out_itemsize      # output tiles (double-buffered)
        + wbuf * (N * H * 2 + H * 4)              # W1 (bf16) + b1 (f32)
        + 2 * (H * tile_n * 2 + tile_n * 4)       # W2 tiles (bf16) + b2 tiles (f32)
        + tile_b * H * 4 + tile_b * tile_n * 4    # f32 intermediates
        + (2 << 20)                               # headroom
    )
    vmem_limit = int(min(max(vmem_needed, 32 << 20), vmem_cap))

    call = _build_pallas_call(B, N, H, tile_b, tile_n, out_dtype, vmem_limit,
                              single_buffer_weights)
    return call(x.astype(jnp.bfloat16), w1_bf, b1_2d, w2_bf, b2_2d)


def _init_params(key, num_params, hidden=512, dtype=jnp.float32):
    """Deterministic init mimicking PyTorch nn.Linear default (uniform +/- 1/sqrt(fan_in))."""
    k1, k2, k3, k4 = jax.random.split(key, 4)
    bound1 = 1.0 / jnp.sqrt(num_params)
    bound2 = 1.0 / jnp.sqrt(hidden)
    # Stored as (in, out) = transpose of PyTorch's (out, in) weight layout.
    w1 = jax.random.uniform(k1, (num_params, hidden), dtype, -bound1, bound1)
    b1 = jax.random.uniform(k2, (hidden,), dtype, -bound1, bound1)
    w2 = jax.random.uniform(k3, (hidden, num_params), dtype, -bound2, bound2)
    b2 = jax.random.uniform(k4, (num_params,), dtype, -bound2, bound2)
    return w1, b1, w2, b2


def _reference(x, w1, b1, w2, b2):
    h = jnp.maximum(x @ w1 + b1, 0.0)
    return jax.nn.sigmoid(h @ w2 + b2)


if __name__ == "__main__":
    num_params = 256   # dimensionality of the grad-norm vector
    hidden = 512
    batch = 8

    key = jax.random.PRNGKey(0)
    kx, kp = jax.random.split(key)
    x = jax.random.normal(kx, (batch, num_params), dtype=jnp.float32)
    w1, b1, w2, b2 = _init_params(kp, num_params, hidden)

    # One-time param preparation (bf16 weights, f32 2-D biases), then a jitted forward.
    kernel_params = prepare_params(w1, b1, w2, b2)
    out = plasticity_controller_forward(x, *kernel_params)
    out = jax.block_until_ready(out)

    ref = _reference(x, w1, b1, w2, b2)
    assert out.shape == (batch, num_params)
    assert out.dtype == jnp.float32
    # bf16 matmuls (f32 accumulation) vs pure-f32 reference: ~1e-2 relative error expected.
    assert jnp.allclose(out, ref, atol=2e-2, rtol=2e-2), "mismatch vs reference"

    print("KERNEL_OK")
</pallas_src>

<mosaic_0001>
module attributes {stable_mosaic.version = 11 : i64} {
  func.func @_mlp_kernel(%arg0: i32, %arg1: i32, %arg2: memref<8x256xbf16, #tpu.memory_space<vmem>>, %arg3: memref<256x512xbf16, #tpu.memory_space<vmem>>, %arg4: memref<1x512xf32, #tpu.memory_space<vmem>>, %arg5: memref<512x256xbf16, #tpu.memory_space<vmem>>, %arg6: memref<1x256xf32, #tpu.memory_space<vmem>>, %arg7: memref<8x256xf32, #tpu.memory_space<vmem>>) attributes {dimension_semantics = [#tpu.dimension_semantics<parallel>, #tpu.dimension_semantics<parallel>], iteration_bounds = array<i64: 1, 1>, scalar_prefetch = 0 : i64, scratch_operands = 0 : i64, tpu.core_type = #tpu.core_type<tc>, window_params = [{transform_indices = @transform_0, window_bounds = array<i64: 8, 256>}, {pipeline_mode = #tpu.pipeline_mode<synchronous>, transform_indices = @transform_1, window_bounds = array<i64: 256, 512>}, {pipeline_mode = #tpu.pipeline_mode<synchronous>, transform_indices = @transform_2, window_bounds = array<i64: 1, 512>}, {transform_indices = @transform_3, window_bounds = array<i64: 512, 256>}, {transform_indices = @transform_4, window_bounds = array<i64: 1, 256>}, {transform_indices = @transform_5, window_bounds = array<i64: 8, 256>}]} {
    %c0 = arith.constant 0 : index
    %c0_0 = arith.constant 0 : index
    %0 = vector.load %arg2[%c0, %c0_0] : memref<8x256xbf16, #tpu.memory_space<vmem>>, vector<8x256xbf16>
    %c0_1 = arith.constant 0 : index
    %c0_2 = arith.constant 0 : index
    %1 = vector.load %arg3[%c0_1, %c0_2] : memref<256x512xbf16, #tpu.memory_space<vmem>>, vector<256x512xbf16>
    %cst = arith.constant dense<0.000000e+00> : vector<8x512xf32>
    %2 = tpu.matmul %0, %1, %cst {dimension_numbers = #tpu.dot_dimension_numbers<[1], [0], [0], [1], [0, 0, 1, 1], [], []>} : vector<8x256xbf16>, vector<256x512xbf16>, vector<8x512xf32> -> vector<8x512xf32>
    %c0_3 = arith.constant 0 : index
    %c0_4 = arith.constant 0 : index
    %3 = vector.load %arg4[%c0_3, %c0_4] : memref<1x512xf32, #tpu.memory_space<vmem>>, vector<1x512xf32>
    %4 = vector.broadcast %3 : vector<1x512xf32> to vector<8x512xf32>
    %5 = arith.addf %2, %4 : vector<8x512xf32>
    %cst_5 = arith.constant 0.000000e+00 : f32
    %6 = vector.broadcast %cst_5 : f32 to vector<8x512xf32>
    %7 = arith.maximumf %5, %6 : vector<8x512xf32>
    %8 = arith.truncf %7 : vector<8x512xf32> to vector<8x512xbf16>
    %c0_6 = arith.constant 0 : index
    %c0_7 = arith.constant 0 : index
    %9 = vector.load %arg5[%c0_6, %c0_7] : memref<512x256xbf16, #tpu.memory_space<vmem>>, vector<512x256xbf16>
    %cst_8 = arith.constant dense<0.000000e+00> : vector<8x256xf32>
    %10 = tpu.matmul %8, %9, %cst_8 {dimension_numbers = #tpu.dot_dimension_numbers<[1], [0], [0], [1], [0, 0, 1, 1], [], []>} : vector<8x512xbf16>, vector<512x256xbf16>, vector<8x256xf32> -> vector<8x256xf32>
    %c0_9 = arith.constant 0 : index
    %c0_10 = arith.constant 0 : index
    %11 = vector.load %arg6[%c0_9, %c0_10] : memref<1x256xf32, #tpu.memory_space<vmem>>, vector<1x256xf32>
    %12 = vector.broadcast %11 : vector<1x256xf32> to vector<8x256xf32>
    %13 = arith.addf %10, %12 : vector<8x256xf32>
    %14 = arith.negf %13 : vector<8x256xf32>
    %15 = math.exp %14 : vector<8x256xf32>
    %cst_11 = arith.constant 1.000000e+00 : f32
    %16 = vector.broadcast %cst_11 : f32 to vector<8x256xf32>
    %17 = arith.addf %16, %15 : vector<8x256xf32>
    %18 = arith.divf %16, %17 : vector<8x256xf32>
    %c0_12 = arith.constant 0 : index
    %c0_13 = arith.constant 0 : index
    %19 = vector.load %arg7[%c0_12, %c0_13] : memref<8x256xf32, #tpu.memory_space<vmem>>, vector<8x256xf32>
    tpu.vector_store %arg7[%c0_12, %c0_13], %18 {strides = array<i32>} : memref<8x256xf32, #tpu.memory_space<vmem>>, vector<8x256xf32>,
    return
  }
  func.func @transform_0(%arg0: i32, %arg1: i32) -> (i32, i32) {
    %c0_i32 = arith.constant 0 : i32
    %c0_i32_0 = arith.constant 0 : i32
    return %arg0, %c0_i32 : i32, i32
  }
  func.func @transform_1(%arg0: i32, %arg1: i32) -> (i32, i32) {
    %c0_i32 = arith.constant 0 : i32
    %c0_i32_0 = arith.constant 0 : i32
    %c0_i32_1 = arith.constant 0 : i32
    return %c0_i32, %c0_i32_0 : i32, i32
  }
  func.func @transform_2(%arg0: i32, %arg1: i32) -> (i32, i32) {
    %c0_i32 = arith.constant 0 : i32
    %c0_i32_0 = arith.constant 0 : i32
    %c0_i32_1 = arith.constant 0 : i32
    return %c0_i32, %c0_i32_0 : i32, i32
  }
  func.func @transform_3(%arg0: i32, %arg1: i32) -> (i32, i32) {
    %c0_i32 = arith.constant 0 : i32
    %c0_i32_0 = arith.constant 0 : i32
    return %c0_i32, %arg1 : i32, i32
  }
  func.func @transform_4(%arg0: i32, %arg1: i32) -> (i32, i32) {
    %c0_i32 = arith.constant 0 : i32
    %c0_i32_0 = arith.constant 0 : i32
    return %c0_i32, %arg1 : i32, i32
  }
  func.func @transform_5(%arg0: i32, %arg1: i32) -> (i32, i32) {
    %c0_i32 = arith.constant 0 : i32
    return %arg0, %arg1 : i32, i32
  }
}

</mosaic_0001>

<bundles_post_ra>
// kernel: plasticity_controller_forward.1
= control target key start
LH: loop header
LB: loop body
LE: loop exit
PB: predicated region body
PF: predicated region fallthrough
CT: control target
= control target key end

     0   :  { %10 = vsyncpa [#allocation3], 0  ;;  %s1596_s0 = inlined_call_operand.vmem [shape: bf16[8,256], index: 0, kind: input, shape index: {}]   ;;  %s1597_s1 = inlined_call_operand.hbm [shape: bf16[256,512], index: 1, kind: input, shape index: {}]   ;;  %s1598_s2 = inlined_call_operand.vmem [shape: f32[1,512], index: 2, kind: input, shape index: {}]   ;;  %s1599_s3 = inlined_call_operand.hbm [shape: bf16[512,256], index: 3, kind: input, shape index: {}]   ;;  %s1600_s4 = inlined_call_operand.vmem [shape: f32[1,256], index: 4, kind: input, shape index: {}]   ;;  %s1601_s5 = inlined_call_operand.hbm [shape: f32[8,256], index: 5, kind: output, shape index: {}]  }
   0x1   :  { %11 = vsyncpa [#allocation6], 0 }
   0x2   :  { %12 = vsyncpa [#allocation4], 0  ;;  %s1480_s18 = smov [#allocation2]   ;;  %s1408_s22 = scalar_lea.hbm %s1597_s1, 8192 }
   0x3   :  { %s20_s19 = sshll.u32 %s1480_s18, 4  ;;  %p1409_p0 = scmp.ne.s32.totalorder %s1597_s1, %s1408_s22  ;;  %s21_s19 = int_to_ptr.vmem [resolvable:$true] %s20_s19 }
   0x4   :  { %p1412_p1 = scmp.lt.u32.totalorder %s1408_s22, %s1597_s1 }
   0x6   :  { %p1414_p2 = pnand %p1412_p1, %p1409_p0 }
   0x8   :  { %1417 = shalt.err (!%p1414_p2)
}
   0x9   :  { %s1418_s27 = scalar_lea.vmem %s21_s19, 8192  ;;  %p1423_p4 = scmp.lt.s32.totalorder %s21_s19, %s21_s19 }
   0xa   :  { %p1419_p3 = scmp.ne.s32.totalorder %s21_s19, %s1418_s27  ;;  %p1424_p5 = scmp.lt.s32.totalorder %s1418_s27, %s1418_s27 }
   0xc   :  { %p1425_p6 = por %p1424_p5, %p1423_p4 }
   0xe   :  { %p1426_p7 = pnand %p1425_p6, %p1419_p3 }
  0x10   :  { %1429 = shalt.err (!%p1426_p7)
}
  0x11   :  { %s1481_s28 = smov 256   ;;  %s1482_s29 = smov 16  }
  0x12   :  { %26 = dma.hbm_to_vmem [thread:$0]  %s1597_s1, 8192, %s21_s19, [#allocation3], %s1481_s28, %s1481_s28, %s1482_s29  }
  0x13   :  { %s1483_s7 = smov [#allocation5]   ;;  %s1430_s11 = scalar_lea.hbm %s1599_s3, 8192 }
  0x14   :  { %s34_s8 = sshll.u32 %s1483_s7, 4  ;;  %p1431_p8 = scmp.ne.s32.totalorder %s1599_s3, %s1430_s11  ;;  %s35_s8 = int_to_ptr.vmem [resolvable:$true] %s34_s8 }
  0x15   :  { %p1434_p9 = scmp.lt.u32.totalorder %s1430_s11, %s1599_s3 }
  0x17   :  { %p1436_p10 = pnand %p1434_p9, %p1431_p8 }
  0x19   :  { %1439 = shalt.err (!%p1436_p10)
}
  0x1a   :  { %s1440_s16 = scalar_lea.vmem %s35_s8, 8192  ;;  %p1445_p12 = scmp.lt.s32.totalorder %s35_s8, %s35_s8 }
  0x1b   :  { %p1441_p11 = scmp.ne.s32.totalorder %s35_s8, %s1440_s16  ;;  %p1446_p13 = scmp.lt.s32.totalorder %s1440_s16, %s1440_s16 }
  0x1d   :  { %p1447_p0 = por %p1446_p13, %p1445_p12 }
  0x1f   :  { %p1448_p1 = pnand %p1447_p0, %p1441_p11 }
  0x21   :  { %1451 = shalt.err (!%p1448_p1)
}
  0x22   :  { %s1484_s1 = smov 128   ;;  %s1485_s17 = smov 8  }
  0x23   :  { %40 = dma.hbm_to_vmem [thread:$0]  %s1599_s3, 8192, %s35_s8, [#allocation6], %s1484_s1, %s1484_s1, %s1485_s17  }
  0x24   :  { %1474 = dma.done.wait [#allocation3], 8192  }
  0x25   :  { %1475 = vsyncadd [#allocation3], 4294959104 }
  0x26   :  { %1476 = dma.done.wait [#allocation6], 8192  }
  0x27   :  { %1477 = vsyncadd [#allocation6], 4294959104  ;;  %v1206_v0 = vld [vmem:[#allocation2 + $0x4] ss:$16 sps:$4 sm:$0xff]   ;;  %v1208_v1 = vld [vmem:[#allocation2] ss:$16 sps:$4 sm:$0xff]  }
  0x28   :  { %463 = vmatprep.subr.bf16.mxu1 %v1206_v0  ;;  %v1209_v2 = vld [vmem:[#allocation2 + $0x24] ss:$16 sps:$4 sm:$0xff]   ;;  %v1211_v3 = vld [vmem:[#allocation2 + $0x20] ss:$16 sps:$4 sm:$0xff]   ;;  %v1258_v45 = vld [vmem:[#allocation2 + $0xc] ss:$16 sps:$4 sm:$0xff]  }
  0x29   :  { %464 = vmatpush1.bf16.msra.mxu1 %v1208_v1  ;;  %v1212_v4 = vld [vmem:[#allocation2 + $0x44] ss:$16 sps:$4 sm:$0xff]   ;;  %v1214_v5 = vld [vmem:[#allocation2 + $0x40] ss:$16 sps:$4 sm:$0xff]   ;;  %v1256_v46 = vld [vmem:[#allocation2 + $0x8] ss:$16 sps:$4 sm:$0xff]  }
  0x2a   :  { %465 = vmatprep.subr.bf16.mxu1 %v1209_v2  ;;  %v1215_v6 = vld [vmem:[#allocation2 + $0x64] ss:$16 sps:$4 sm:$0xff]   ;;  %v1217_v7 = vld [vmem:[#allocation2 + $0x60] ss:$16 sps:$4 sm:$0xff]   ;;  %v1261_v49 = vld [vmem:[#allocation2 + $0x2c] ss:$16 sps:$4 sm:$0xff]  }
  0x2b   :  { %v1218_v8 = vld [vmem:[#allocation2 + $0x84] ss:$16 sps:$4 sm:$0xff]   ;;  %v1220_v9 = vld [vmem:[#allocation2 + $0x80] ss:$16 sps:$4 sm:$0xff]   ;;  %v1259_v52 = vld [vmem:[#allocation2 + $0x28] ss:$16 sps:$4 sm:$0xff]  }
  0x2c   :  { %v1221_v10 = vld [vmem:[#allocation2 + $0xa4] ss:$16 sps:$4 sm:$0xff]   ;;  %v1223_v11 = vld [vmem:[#allocation2 + $0xa0] ss:$16 sps:$4 sm:$0xff]   ;;  %v1264_v54 = vld [vmem:[#allocation2 + $0x4c] ss:$16 sps:$4 sm:$0xff]  }
  0x2d   :  { %466 = vmatpush1.bf16.msra.mxu1 %v1211_v3  ;;  %v1224_v12 = vld [vmem:[#allocation2 + $0xc4] ss:$16 sps:$4 sm:$0xff]   ;;  %v1226_v15 = vld [vmem:[#allocation2 + $0xc0] ss:$16 sps:$4 sm:$0xff]   ;;  %v1262_v56 = vld [vmem:[#allocation2 + $0x48] ss:$16 sps:$4 sm:$0xff]  }
  0x2e   :  { %467 = vmatprep.subr.bf16.mxu1 %v1212_v4  ;;  %v1544_v13 = vld [vmem:[%s1596_s0] sm:$0xff]  ;;  %v1307_v29 = vld [vmem:[#allocation5 + $0x14] ss:$8 sps:$4 sm:$0xff]   ;;  %v1309_v31 = vld [vmem:[#allocation5 + $0x10] ss:$8 sps:$4 sm:$0xff]  }
  0x2f   :  { %v1548_v14 = vcombine.high %v1544_v13, %v1544_v13  ;;  %v1227_v16 = vld [vmem:[#allocation2 + $0xe4] ss:$16 sps:$4 sm:$0xff]   ;;  %v1229_v17 = vld [vmem:[#allocation2 + $0xe0] ss:$16 sps:$4 sm:$0xff]   ;;  %v1553_v48 = vcombine.low %v1544_v13, %v1544_v13  ;;  %v1267_v58 = vld [vmem:[#allocation2 + $0x6c] ss:$16 sps:$4 sm:$0xff]  }
  0x30   :  { %v1230_v18 = vld [vmem:[#allocation2 + $0x104] ss:$16 sps:$4 sm:$0xff]   ;;  %v1232_v19 = vld [vmem:[#allocation2 + $0x100] ss:$16 sps:$4 sm:$0xff]   ;;  %v1265_v60 = vld [vmem:[#allocation2 + $0x68] ss:$16 sps:$4 sm:$0xff]  }
  0x31   :  { %468 = vmatpush1.bf16.msra.mxu1 %v1214_v5  ;;  %495 = vmatprep.mubr.bf16.mxu1 %v1548_v14  ;;  %v1233_v20 = vld [vmem:[#allocation2 + $0x124] ss:$16 sps:$4 sm:$0xff]   ;;  %v1235_v21 = vld [vmem:[#allocation2 + $0x120] ss:$16 sps:$4 sm:$0xff]   ;;  %v1270_v62 = vld [vmem:[#allocation2 + $0x8c] ss:$16 sps:$4 sm:$0xff]  }
  0x32   :  { %469 = vmatprep.subr.bf16.mxu1 %v1215_v6  ;;  %v1236_v22 = vld [vmem:[#allocation2 + $0x144] ss:$16 sps:$4 sm:$0xff]   ;;  %v1238_v23 = vld [vmem:[#allocation2 + $0x140] ss:$16 sps:$4 sm:$0xff]   ;;  %v1268_v0 = vld [vmem:[#allocation2 + $0x88] ss:$16 sps:$4 sm:$0xff]  }
  0x33   :  { %v1239_v24 = vld [vmem:[#allocation2 + $0x164] ss:$16 sps:$4 sm:$0xff]   ;;  %v1241_v25 = vld [vmem:[#allocation2 + $0x160] ss:$16 sps:$4 sm:$0xff]   ;;  %v1273_v2 = vld [vmem:[#allocation2 + $0xac] ss:$16 sps:$4 sm:$0xff]  }
  0x34   :  { %v1242_v26 = vld [vmem:[#allocation2 + $0x184] ss:$16 sps:$4 sm:$0xff]   ;;  %v1306_v28 = vld [vmem:[#allocation5] ss:$8 sps:$4 sm:$0xff]   ;;  %v1315_v39 = vld [vmem:[#allocation5 + $0x30] ss:$8 sps:$4 sm:$0xff]  }
  0x35   :  { %470 = vmatpush1.bf16.msra.mxu1 %v1217_v7  ;;  %v1304_v27 = vld [vmem:[#allocation5 + $0x4] ss:$8 sps:$4 sm:$0xff]   ;;  %v1244_v30 = vld [vmem:[#allocation2 + $0x180] ss:$16 sps:$4 sm:$0xff]   ;;  %v1313_v36 = vld [vmem:[#allocation5 + $0x34] ss:$8 sps:$4 sm:$0xff]  }
  0x36   :  { %471 = vmatprep.subr.bf16.mxu1 %v1218_v8  ;;  %949 = vmatprep.subr.bf16.mxu0 %v1304_v27  ;;  %v1310_v32 = vld [vmem:[#allocation5 + $0x24] ss:$8 sps:$4 sm:$0xff]   ;;  %v1247_v34 = vld [vmem:[#allocation2 + $0x1a0] ss:$16 sps:$4 sm:$0xff]   ;;  %v1319_v44 = vld [vmem:[#allocation5 + $0x54] ss:$8 sps:$4 sm:$0xff]  }
  0x37   :  { %950 = vmatpush1.bf16.msra.mxu0 %v1306_v28  ;;  %v1245_v33 = vld [vmem:[#allocation2 + $0x1a4] ss:$16 sps:$4 sm:$0xff]   ;;  %v1312_v35 = vld [vmem:[#allocation5 + $0x20] ss:$8 sps:$4 sm:$0xff]   ;;  %v1321_v47 = vld [vmem:[#allocation5 + $0x50] ss:$8 sps:$4 sm:$0xff]  }
  0x38   :  { %951 = vmatprep.subr.bf16.mxu0 %v1307_v29  ;;  %v1248_v37 = vld [vmem:[#allocation2 + $0x1c4] ss:$16 sps:$4 sm:$0xff]   ;;  %v1250_v38 = vld [vmem:[#allocation2 + $0x1c0] ss:$16 sps:$4 sm:$0xff]   ;;  %v1271_v4 = vld [vmem:[#allocation2 + $0xa8] ss:$16 sps:$4 sm:$0xff]  }
  0x39   :  { %472 = vmatpush1.bf16.msra.mxu1 %v1220_v9  ;;  %v1316_v40 = vld [vmem:[#allocation5 + $0x44] ss:$8 sps:$4 sm:$0xff]   ;;  %v1253_v42 = vld [vmem:[#allocation2 + $0x1e0] ss:$16 sps:$4 sm:$0xff]   ;;  %v1325_v53 = vld [vmem:[#allocation5 + $0x74] ss:$8 sps:$4 sm:$0xff]  }
  0x3a   :  { %473 = vmatprep.subr.bf16.mxu1 %v1221_v10  ;;  %v1251_v41 = vld [vmem:[#allocation2 + $0x1e4] ss:$16 sps:$4 sm:$0xff]   ;;  %v1318_v43 = vld [vmem:[#allocation5 + $0x40] ss:$8 sps:$4 sm:$0xff]   ;;  %v1327_v55 = vld [vmem:[#allocation5 + $0x70] ss:$8 sps:$4 sm:$0xff]  }
  0x3b   :  { %952 = vmatpush1.bf16.msra.mxu0 %v1309_v31  ;;  %v1322_v50 = vld [vmem:[#allocation5 + $0x64] ss:$8 sps:$4 sm:$0xff]   ;;  %v1324_v51 = vld [vmem:[#allocation5 + $0x60] ss:$8 sps:$4 sm:$0xff]   ;;  %v1331_v61 = vld [vmem:[#allocation5 + $0x94] ss:$8 sps:$4 sm:$0xff]  }
  0x3c   :  { %953 = vmatprep.subr.bf16.mxu0 %v1310_v32  ;;  %v1328_v57 = vld [vmem:[#allocation5 + $0x84] ss:$8 sps:$4 sm:$0xff]   ;;  %v1330_v59 = vld [vmem:[#allocation5 + $0x80] ss:$8 sps:$4 sm:$0xff]   ;;  %v1333_v63 = vld [vmem:[#allocation5 + $0x90] ss:$8 sps:$4 sm:$0xff]  }
  0x3d   :  { %474 = vmatpush1.bf16.msra.mxu1 %v1223_v11  ;;  %v1334_v1 = vld [vmem:[#allocation5 + $0xa4] ss:$8 sps:$4 sm:$0xff]   ;;  %v1336_v3 = vld [vmem:[#allocation5 + $0xa0] ss:$8 sps:$4 sm:$0xff]   ;;  %v1337_v5 = vld [vmem:[#allocation5 + $0xb4] ss:$8 sps:$4 sm:$0xff]  }
  0x3e   :  { %475 = vmatprep.subr.bf16.mxu1 %v1224_v12  ;;  %v1276_v6 = vld [vmem:[#allocation2 + $0xcc] ss:$16 sps:$4 sm:$0xff]   ;;  %v1339_v7 = vld [vmem:[#allocation5 + $0xb0] ss:$8 sps:$4 sm:$0xff]   ;;  %v1342_v11 = vld [vmem:[#allocation5 + $0xc0] ss:$8 sps:$4 sm:$0xff]  }
  0x3f   :  { %954 = vmatpush1.bf16.msra.mxu0 %v1312_v35  ;;  %v1274_v8 = vld [vmem:[#allocation2 + $0xc8] ss:$16 sps:$4 sm:$0xff]   ;;  %v1340_v9 = vld [vmem:[#allocation5 + $0xc4] ss:$8 sps:$4 sm:$0xff]   ;;  %v1343_v13 = vld [vmem:[#allocation5 + $0xd4] ss:$8 sps:$4 sm:$0xff]  }
  0x40   :  { %955 = vmatprep.subr.bf16.mxu0 %v1313_v36  ;;  %v1279_v10 = vld [vmem:[#allocation2 + $0xec] ss:$16 sps:$4 sm:$0xff]   ;;  %v1277_v12 = vld [vmem:[#allocation2 + $0xe8] ss:$16 sps:$4 sm:$0xff]   ;;  %v116_v36 = vlaneseq }
  0x41   :  { %476 = vmatpush1.bf16.msra.mxu1 %v1226_v15  ;;  %v1345_v15 = vld [vmem:[#allocation5 + $0xd0] ss:$8 sps:$4 sm:$0xff]   ;;  %v1300_v27 = vld [vmem:[#allocation2 + $0x1cc] ss:$16 sps:$4 sm:$0xff]   ;;  %v1348_v32 = vld [vmem:[#allocation5 + $0xe0] ss:$8 sps:$4 sm:$0xff]  }
  0x42   :  { %477 = vmatprep.subr.bf16.mxu1 %v1227_v16  ;;  %v1280_v16 = vld [vmem:[#allocation2 + $0x108] ss:$16 sps:$4 sm:$0xff]   ;;  %v1303_v29 = vld [vmem:[#allocation2 + $0x1ec] ss:$16 sps:$4 sm:$0xff]  }
  0x43   :  { %956 = vmatpush1.bf16.msra.mxu0 %v1315_v39  ;;  %v1298_v28 = vld [vmem:[#allocation2 + $0x1c8] ss:$16 sps:$4 sm:$0xff]   ;;  %v1346_v31 = vld [vmem:[#allocation5 + $0xe4] ss:$8 sps:$4 sm:$0xff]   ;;  %v1564_v39 = vld [vmem:[%s1598_s2] sm:$0xf] }
  0x44   :  { %957 = vmatprep.subr.bf16.mxu0 %v1316_v40  ;;  %v1354_v35 = vld [vmem:[#allocation5 + $0x104] ss:$8 sps:$4 sm:$0xff]  }
  0x45   :  { %478 = vmatpush1.bf16.msra.mxu1 %v1229_v17  ;;  %v1285_v17 = vld [vmem:[#allocation2 + $0x12c] ss:$16 sps:$4 sm:$0xff]  }
  0x46   :  { %479 = vmatprep.subr.bf16.mxu1 %v1230_v18  ;;  %v1283_v18 = vld [vmem:[#allocation2 + $0x128] ss:$16 sps:$4 sm:$0xff]  }
  0x47   :  { %958 = vmatpush1.bf16.msra.mxu0 %v1318_v43 }
  0x48   :  { %959 = vmatprep.subr.bf16.mxu0 %v1319_v44 }
  0x49   :  { %480 = vmatpush1.bf16.msra.mxu1 %v1232_v19  ;;  %v1288_v19 = vld [vmem:[#allocation2 + $0x14c] ss:$16 sps:$4 sm:$0xff]  }
  0x4a   :  { %481 = vmatprep.subr.bf16.mxu1 %v1233_v20  ;;  %v1286_v20 = vld [vmem:[#allocation2 + $0x148] ss:$16 sps:$4 sm:$0xff]  }
  0x4b   :  { %960 = vmatpush1.bf16.msra.mxu0 %v1321_v47 }
  0x4c   :  { %961 = vmatprep.subr.bf16.mxu0 %v1322_v50 }
  0x4d   :  { %482 = vmatpush1.bf16.msra.mxu1 %v1235_v21  ;;  %v1291_v21 = vld [vmem:[#allocation2 + $0x16c] ss:$16 sps:$4 sm:$0xff]  }
  0x4e   :  { %483 = vmatprep.subr.bf16.mxu1 %v1236_v22  ;;  %v1289_v22 = vld [vmem:[#allocation2 + $0x168] ss:$16 sps:$4 sm:$0xff]  }
  0x4f   :  { %962 = vmatpush1.bf16.msra.mxu0 %v1324_v51 }
  0x50   :  { %963 = vmatprep.subr.bf16.mxu0 %v1325_v53  ;;  %v1352_v53 = vld [vmem:[#allocation5 + $0x100] ss:$8 sps:$4 sm:$0xff]  }
  0x51   :  { %484 = vmatpush1.bf16.msra.mxu1 %v1238_v23  ;;  %v1294_v23 = vld [vmem:[#allocation2 + $0x18c] ss:$16 sps:$4 sm:$0xff]  }
  0x52   :  { %485 = vmatprep.subr.bf16.mxu1 %v1239_v24  ;;  %v1292_v24 = vld [vmem:[#allocation2 + $0x188] ss:$16 sps:$4 sm:$0xff]  }
  0x53   :  { %964 = vmatpush1.bf16.msra.mxu0 %v1327_v55  ;;  %v1355_v55 = vld [vmem:[#allocation5 + $0x110] ss:$8 sps:$4 sm:$0xff]  }
  0x54   :  { %965 = vmatprep.subr.bf16.mxu0 %v1328_v57  ;;  %v1358_v57 = vld [vmem:[#allocation5 + $0x120] ss:$8 sps:$4 sm:$0xff]  }
  0x55   :  { %486 = vmatpush1.bf16.msra.mxu1 %v1241_v25  ;;  %v1297_v25 = vld [vmem:[#allocation2 + $0x1ac] ss:$16 sps:$4 sm:$0xff]  }
  0x56   :  { %487 = vmatprep.subr.bf16.mxu1 %v1242_v26  ;;  %v1295_v26 = vld [vmem:[#allocation2 + $0x1a8] ss:$16 sps:$4 sm:$0xff]  }
  0x57   :  { %966 = vmatpush1.bf16.msra.mxu0 %v1330_v59  ;;  %v1361_v59 = vld [vmem:[#allocation5 + $0x130] ss:$8 sps:$4 sm:$0xff]  }
  0x58   :  { %967 = vmatprep.subr.bf16.mxu0 %v1331_v61  ;;  %v1364_v61 = vld [vmem:[#allocation5 + $0x140] ss:$8 sps:$4 sm:$0xff]  }
  0x59   :  { %488 = vmatpush1.bf16.msra.mxu1 %v1244_v30  ;;  %v1301_v30 = vld [vmem:[#allocation2 + $0x1e8] ss:$16 sps:$4 sm:$0xff]  }
  0x5a   :  { %489 = vmatprep.subr.bf16.mxu1 %v1245_v33  ;;  %v1349_v33 = vld [vmem:[#allocation5 + $0xf4] ss:$8 sps:$4 sm:$0xff]  }
  0x5b   :  { %968 = vmatpush1.bf16.msra.mxu0 %v1333_v63  ;;  %v1367_v63 = vld [vmem:[#allocation5 + $0x150] ss:$8 sps:$4 sm:$0xff]  }
  0x5c   :  { %969 = vmatprep.subr.bf16.mxu0 %v1334_v1  ;;  %v1370_v1 = vld [vmem:[#allocation5 + $0x160] ss:$8 sps:$4 sm:$0xff]  }
  0x5d   :  { %490 = vmatpush1.bf16.msra.mxu1 %v1247_v34  ;;  %v1351_v34 = vld [vmem:[#allocation5 + $0xf0] ss:$8 sps:$4 sm:$0xff]  }
  0x5e   :  { %491 = vmatprep.subr.bf16.mxu1 %v1248_v37  ;;  %v1558_v37 = vshrl.u32 %v116_v36, 7 }
  0x5f   :  { %970 = vmatpush1.bf16.msra.mxu0 %v1336_v3  ;;  %v1373_v3 = vld [vmem:[#allocation5 + $0x170] ss:$8 sps:$4 sm:$0xff]  }
  0x60   :  { %971 = vmatprep.subr.bf16.mxu0 %v1337_v5  ;;  %v122_v40 = vsub.s32 1, %v1558_v37  ;;  %v1376_v5 = vld [vmem:[#allocation5 + $0x180] ss:$8 sps:$4 sm:$0xff]  }
  0x61   :  { %492 = vmatpush1.bf16.msra.mxu1 %v1250_v38  ;;  %v118_v38 = vsub.s32 0, %v1558_v37 }
  0x62   :  { %493 = vmatprep.subr.bf16.mxu1 %v1251_v41 }
  0x63   :  { %972 = vmatpush1.bf16.msra.mxu0 %v1339_v7  ;;  %v119_v41 = vrot.slane %v1564_v39, %v118_v38  ;;  %v1379_v7 = vld [vmem:[#allocation5 + $0x190] ss:$8 sps:$4 sm:$0xff]  }
  0x64   :  { %973 = vmatprep.subr.bf16.mxu0 %v1340_v9  ;;  %v1382_v9 = vld [vmem:[#allocation5 + $0x1a0] ss:$8 sps:$4 sm:$0xff]  }
  0x65   :  { %494 = vmatpush1.bf16.msra.mxu1 %v1253_v42  ;;  %v123_v42 = vrot.slane %v1564_v39, %v122_v40 }
  0x66   :  { %504 = vmatprep.subr.bf16.mxu1 %v1258_v45 }
  0x67   :  { %974 = vmatpush1.bf16.msra.mxu0 %v1342_v11  ;;  %v1385_v11 = vld [vmem:[#allocation5 + $0x1b0] ss:$8 sps:$4 sm:$0xff]  }
  0x68   :  { %496 = vmatmul.mubr.bf16.vlgmr.msra.gmra.mrb[0].mxu1 %v1553_v48  ;;  %975 = vmatprep.subr.bf16.mxu0 %v1343_v13  ;;  %v1388_v13 = vld [vmem:[#allocation5 + $0x1c0] ss:$8 sps:$4 sm:$0xff]  }
  0x69   :  { %505 = vmatpush1.bf16.msra.mxu1 %v1256_v46  ;;  %536 = vmatprep.mubr.bf16.mxu1 %v1548_v14  ;;  %v1282_v14 = vld [vmem:[#allocation2 + $0x10c] ss:$16 sps:$4 sm:$0xff]  }
  0x6a   :  { %506 = vmatprep.subr.bf16.mxu1 %v1261_v49 }
  0x6b   :  { %976 = vmatpush1.bf16.msra.mxu0 %v1345_v15  ;;  %v126_v15 = vsub.s32 2, %v1558_v37 }
  0x6c   :  { %977 = vmatprep.subr.bf16.mxu0 %v1346_v31 }
  0x6d   :  { %507 = vmatpush1.bf16.msra.mxu1 %v1259_v52 }
  0x6e   :  { %508 = vmatprep.subr.bf16.mxu1 %v1264_v54  ;;  %v1357_v54 = vld [vmem:[#allocation5 + $0x114] ss:$8 sps:$4 sm:$0xff]  }
  0x6f   :  { %978 = vmatpush1.bf16.msra.mxu0 %v1348_v32 }
  0x70   :  { %979 = vmatprep.subr.bf16.mxu0 %v1349_v33 }
  0x71   :  { %509 = vmatpush1.bf16.msra.mxu1 %v1262_v56  ;;  %v1360_v56 = vld [vmem:[#allocation5 + $0x124] ss:$8 sps:$4 sm:$0xff]  }
  0x72   :  { %510 = vmatprep.subr.bf16.mxu1 %v1267_v58  ;;  %v1363_v58 = vld [vmem:[#allocation5 + $0x134] ss:$8 sps:$4 sm:$0xff]  }
  0x73   :  { %980 = vmatpush1.bf16.msra.mxu0 %v1351_v34  ;;  %v617_v34 = vld [vmem:[%s1600_s4] sm:$0x3]  ;;  %s1486_s4 = smov [#allocation7]  }
  0x74   :  { %990 = vmatprep.subr.bf16.mxu0 %v1354_v35  ;;  %v622_v35 = vrot.slane %v617_v34, %v118_v38  ;;  %v626_v36 = vrot.slane %v617_v34, %v122_v40  ;;  %s1051_s23 = sshll.u32 %s1486_s4, 4  ;;  %s1052_s23 = int_to_ptr.vmem [resolvable:$true] %s1051_s23 }
  0x75   :  { %511 = vmatpush1.bf16.msra.mxu1 %v1265_v60  ;;  %v1366_v60 = vld [vmem:[#allocation5 + $0x144] ss:$8 sps:$4 sm:$0xff]   ;;  %s1452_s24 = scalar_lea.vmem %s1052_s23, 256  ;;  %p1457_p3 = scmp.lt.s32.totalorder %s1052_s23, %s1052_s23 }
  0x76   :  { %512 = vmatprep.subr.bf16.mxu1 %v1270_v62  ;;  %v1369_v62 = vld [vmem:[#allocation5 + $0x154] ss:$8 sps:$4 sm:$0xff]   ;;  %p1453_p2 = scmp.ne.s32.totalorder %s1052_s23, %s1452_s24  ;;  %p1458_p4 = scmp.lt.s32.totalorder %s1452_s24, %s1452_s24 }
  0x78   :  { %p1459_p5 = por %p1458_p4, %p1457_p3 }
  0x79   :  { %513 = vmatpush1.bf16.msra.mxu1 %v1268_v0  ;;  %v1372_v0 = vld [vmem:[#allocation5 + $0x164] ss:$8 sps:$4 sm:$0xff]  }
  0x7a   :  { %514 = vmatprep.subr.bf16.mxu1 %v1273_v2  ;;  %v1375_v2 = vld [vmem:[#allocation5 + $0x174] ss:$8 sps:$4 sm:$0xff]   ;;  %p1460_p6 = pnand %p1459_p5, %p1453_p2 }
  0x7d   :  { %515 = vmatpush1.bf16.msra.mxu1 %v1271_v4  ;;  %v1378_v4 = vld [vmem:[#allocation5 + $0x184] ss:$8 sps:$4 sm:$0xff]  }
  0x7e   :  { %516 = vmatprep.subr.bf16.mxu1 %v1276_v6  ;;  %v1381_v6 = vld [vmem:[#allocation5 + $0x194] ss:$8 sps:$4 sm:$0xff]  }
  0x81   :  { %517 = vmatpush1.bf16.msra.mxu1 %v1274_v8  ;;  %v1384_v8 = vld [vmem:[#allocation5 + $0x1a4] ss:$8 sps:$4 sm:$0xff]  }
  0x82   :  { %518 = vmatprep.subr.bf16.mxu1 %v1279_v10  ;;  %v1387_v10 = vld [vmem:[#allocation5 + $0x1b4] ss:$8 sps:$4 sm:$0xff]  }
  0x85   :  { %519 = vmatpush1.bf16.msra.mxu1 %v1277_v12  ;;  %v1390_v12 = vld [vmem:[#allocation5 + $0x1c4] ss:$8 sps:$4 sm:$0xff]  }
  0x86   :  { %520 = vmatprep.subr.bf16.mxu1 %v1282_v14  ;;  %v1393_v14 = vld [vmem:[#allocation5 + $0x1d4] ss:$8 sps:$4 sm:$0xff]  }
  0x89   :  { %521 = vmatpush1.bf16.msra.mxu1 %v1280_v16  ;;  %v1391_v16 = vld [vmem:[#allocation5 + $0x1d0] ss:$8 sps:$4 sm:$0xff]  }
  0x8a   :  { %522 = vmatprep.subr.bf16.mxu1 %v1285_v17  ;;  %v130_v17 = vsub.s32 3, %v1558_v37 }
  0x8d   :  { %523 = vmatpush1.bf16.msra.mxu1 %v1283_v18  ;;  %v1396_v18 = vld [vmem:[#allocation5 + $0x1e4] ss:$8 sps:$4 sm:$0xff]  }
  0x8e   :  { %524 = vmatprep.subr.bf16.mxu1 %v1288_v19  ;;  %v127_v19 = vrot.slane %v1564_v39, %v126_v15 }
  0x91   :  { %525 = vmatpush1.bf16.msra.mxu1 %v1286_v20  ;;  %v131_v20 = vrot.slane %v1564_v39, %v130_v17 }
  0x92   :  { %526 = vmatprep.subr.bf16.mxu1 %v1291_v21  ;;  %v1394_v21 = vld [vmem:[#allocation5 + $0x1e0] ss:$8 sps:$4 sm:$0xff]  }
  0x95   :  { %527 = vmatpush1.bf16.msra.mxu1 %v1289_v22  ;;  %v1399_v22 = vld [vmem:[#allocation5 + $0x1f4] ss:$8 sps:$4 sm:$0xff]  }
  0x96   :  { %528 = vmatprep.subr.bf16.mxu1 %v1294_v23 }
  0x99   :  { %529 = vmatpush1.bf16.msra.mxu1 %v1292_v24 }
  0x9a   :  { %530 = vmatprep.subr.bf16.mxu1 %v1297_v25 }
  0x9d   :  { %531 = vmatpush1.bf16.msra.mxu1 %v1295_v26 }
  0x9e   :  { %532 = vmatprep.subr.bf16.mxu1 %v1300_v27 }
  0xa1   :  { %533 = vmatpush1.bf16.msra.mxu1 %v1298_v28  ;;  %v1397_v28 = vld [vmem:[#allocation5 + $0x1f0] ss:$8 sps:$4 sm:$0xff]  }
  0xa2   :  { %534 = vmatprep.subr.bf16.mxu1 %v1303_v29 }
  0xa5   :  { %535 = vmatpush1.bf16.msra.mxu1 %v1301_v30 }
  0xa8   :  { %537 = vmatmul.mubr.bf16.vlgmr.msra.gmra.mrb[4].mxu1 %v1553_v48 }
 0x13b   :  { %v497_v43 = vpop.f32.mrb[0].mxu1 }
 0x13c   :  { %v498_v44 = vadd.f32 %v497_v43, %v119_v41  ;;  %v499_v45 = vpop.f32.mrb[1].mxu1 }
 0x13d   :  { %v500_v46 = vadd.f32 %v499_v45, %v123_v42  ;;  %v501_v47 = vpop.f32.mrb[2].mxu1 }
 0x13e   :  { %v545_v48 = vmax.f32 %v498_v44, 0.0  ;;  %v502_v49 = vpop.f32.mrb[3].mxu1 }
 0x13f   :  { %v546_v50 = vmax.f32 %v500_v46, 0.0 }
 0x140   :  { %v549_v51 = vpack.c.bf16 %v545_v48, %v545_v48 }
 0x141   :  { %v550_v52 = vpack.c.bf16 %v546_v50, %v546_v50 }
 0x143   :  { %981 = vmatprep.mubr.bf16.mxu0 %v550_v52 }
 0x144   :  { %982 = vmatmul.mubr.bf16.vlgmr.msra.gmra.mrb[0].mxu0 %v549_v51 }
 0x145   :  { %991 = vmatpush1.bf16.msra.mxu0 %v1352_v53 }
 0x146   :  { %992 = vmatprep.subr.bf16.mxu0 %v1357_v54 }
 0x149   :  { %993 = vmatpush1.bf16.msra.mxu0 %v1355_v55 }
 0x14a   :  { %994 = vmatprep.subr.bf16.mxu0 %v1360_v56 }
 0x14d   :  { %995 = vmatpush1.bf16.msra.mxu0 %v1358_v57 }
 0x14e   :  { %996 = vmatprep.subr.bf16.mxu0 %v1363_v58 }
 0x151   :  { %997 = vmatpush1.bf16.msra.mxu0 %v1361_v59 }
 0x152   :  { %998 = vmatprep.subr.bf16.mxu0 %v1366_v60 }
 0x155   :  { %999 = vmatpush1.bf16.msra.mxu0 %v1364_v61 }
 0x156   :  { %1000 = vmatprep.subr.bf16.mxu0 %v1369_v62 }
 0x159   :  { %1001 = vmatpush1.bf16.msra.mxu0 %v1367_v63 }
 0x15a   :  { %1002 = vmatprep.subr.bf16.mxu0 %v1372_v0 }
 0x15d   :  { %1003 = vmatpush1.bf16.msra.mxu0 %v1370_v1 }
 0x15e   :  { %1004 = vmatprep.subr.bf16.mxu0 %v1375_v2 }
 0x161   :  { %1005 = vmatpush1.bf16.msra.mxu0 %v1373_v3 }
 0x162   :  { %1006 = vmatprep.subr.bf16.mxu0 %v1378_v4 }
 0x165   :  { %1007 = vmatpush1.bf16.msra.mxu0 %v1376_v5 }
 0x166   :  { %1008 = vmatprep.subr.bf16.mxu0 %v1381_v6 }
 0x169   :  { %1009 = vmatpush1.bf16.msra.mxu0 %v1379_v7 }
 0x16a   :  { %1010 = vmatprep.subr.bf16.mxu0 %v1384_v8 }
 0x16d   :  { %1011 = vmatpush1.bf16.msra.mxu0 %v1382_v9 }
 0x16e   :  { %1012 = vmatprep.subr.bf16.mxu0 %v1387_v10 }
 0x171   :  { %1013 = vmatpush1.bf16.msra.mxu0 %v1385_v11 }
 0x172   :  { %1014 = vmatprep.subr.bf16.mxu0 %v1390_v12 }
 0x175   :  { %1015 = vmatpush1.bf16.msra.mxu0 %v1388_v13 }
 0x176   :  { %1016 = vmatprep.subr.bf16.mxu0 %v1393_v14 }
 0x179   :  { %1017 = vmatpush1.bf16.msra.mxu0 %v1391_v16 }
 0x17a   :  { %1018 = vmatprep.subr.bf16.mxu0 %v1396_v18 }
 0x17b   :  { %v538_v23 = vpop.f32.mrb[4].mxu1 }
 0x17c   :  { %v539_v24 = vadd.f32 %v538_v23, %v127_v19  ;;  %v540_v25 = vpop.f32.mrb[5].mxu1 }
 0x17d   :  { %v541_v26 = vadd.f32 %v540_v25, %v131_v20  ;;  %v542_v27 = vpop.f32.mrb[6].mxu1  ;;  %1019 = vmatpush1.bf16.msra.mxu0 %v1394_v21 }
 0x17e   :  { %v547_v29 = vmax.f32 %v539_v24, 0.0  ;;  %v543_v30 = vpop.f32.mrb[7].mxu1  ;;  %1020 = vmatprep.subr.bf16.mxu0 %v1399_v22 }
 0x17f   :  { %v548_v31 = vmax.f32 %v541_v26, 0.0 }
 0x180   :  { %v551_v33 = vpack.c.bf16 %v547_v29, %v547_v29 }
 0x181   :  { %v552_v32 = vpack.c.bf16 %v548_v31, %v548_v31  ;;  %1021 = vmatpush1.bf16.msra.mxu0 %v1397_v28 }
 0x183   :  { %1022 = vmatprep.mubr.bf16.mxu0 %v552_v32 }
 0x184   :  { %1023 = vmatmul.mubr.bf16.vlgmr.msra.gmra.mrb[0].mxu0 %v551_v33 }
 0x257   :  { %v1024_v39 = vpop.f32.mrb[0].mxu0 }
 0x258   :  { %v1193_v41 = vadd.f32 %v1024_v39, %v622_v35  ;;  %v1026_v42 = vpop.f32.mrb[1].mxu0 }
 0x259   :  { %v1194_v43 = vadd.f32 %v1026_v42, %v626_v36  ;;  %v1028_v44 = vpop.f32.mrb[2].mxu0 }
 0x25a   :  { %v1191_v45 = vmul.f32 -1.442695, %v1193_v41  ;;  %v1029_v46 = vpop.f32.mrb[3].mxu0 }
 0x25b   :  { %v1192_v47 = vmul.f32 -1.442695, %v1194_v43 }
 0x25c   :  { %1400 = vpow2.f32 %v1191_v45 }
 0x25d   :  { %1402 = vpow2.f32 %v1192_v47 }
 0x266   :  { %v1401_v48 = vpop.eup %1400 }
 0x267   :  { %v1403_v49 = vpop.eup %1402  ;;  %v1037_v50 = vadd.f32 1.0, %v1401_v48 }
 0x268   :  { %v1038_v51 = vadd.f32 1.0, %v1403_v49 }
 0x269   :  { %1404 = vrcp.f32 %v1037_v50 }
 0x26a   :  { %1406 = vrcp.f32 %v1038_v51 }
 0x273   :  { %v1405_v37 = vpop.eup %1404 }
 0x274   :  { %v1407_v38 = vpop.eup %1406  ;;  %1043 = vst [vmem:[#allocation7] sm:$0xff] %v1405_v37 }
 0x275   :  { %1044 = vst [vmem:[#allocation7 + $0x8] sm:$0xff] %v1407_v38 }
 0x276   :  { %1463 = shalt.err (!%p1460_p6)
}
 0x277   :  { %s1464_s27 = scalar_lea.hbm %s1601_s5, 256 }
 0x278   :  { %p1465_p7 = scmp.ne.s32.totalorder %s1601_s5, %s1464_s27  ;;  %p1468_p8 = scmp.lt.u32.totalorder %s1464_s27, %s1601_s5 }
 0x27a   :  { %p1470_p9 = pnand %p1468_p8, %p1465_p7 }
 0x27c   :  { %1473 = shalt.err (!%p1470_p9)
}
 0x27d   :  { %1054 = dma.vmem_to_hbm [thread:$0]  %s1052_s23, 256, %s1601_s5, [#allocation4]  }
 0x27e   :  { %1478 = dma.done.wait [#allocation4], 256  }
 0x27f   :  { %1479 = vsyncadd [#allocation4], 4294967040 }
 0x280   :  { %1058 = vsyncpa [#allocation3], 1 }
 0x281   :  { %1059 = vsyncpa [#allocation6], 1 }
 0x282   :  { %1060 = vsyncpa [#allocation4], 1 }

</bundles_post_ra>
